<compile_context>
chip_gen: v5e
topology: v5e:2x2
jax: 0.10.0
libtpu: 0.0.40
codegen_flags: <defaults>
</compile_context>

<pallas_src>
import functools

import numpy as np
import jax
import jax.numpy as jnp
from jax.experimental import pallas as pl
from jax.experimental.pallas import tpu as pltpu


# ---------------------------------------------------------------------------
# adjacency construction (host-side NumPy glue, mirrors create_adj_matrix)
# ---------------------------------------------------------------------------
def create_adj_matrix(size: int) -> jnp.ndarray:
    col, row = np.meshgrid(np.arange(size), np.arange(size))
    coord = np.stack((col, row), axis=2).reshape(-1, 2) / size          # (N, 2)
    diff = coord[:, None, :] - coord[None, :, :]
    dist = np.sqrt((diff ** 2).sum(-1)).astype(np.float32)              # cdist
    sigma_dist = np.var(dist, ddof=1)                                   # torch.var -> unbiased
    A = np.exp(-dist ** 2 / sigma_dist)
    A[A <= 1e-05] = 0.0
    d = A.sum(axis=1)
    D_hat = np.diag(1.0 / np.sqrt(d))                                   # sqrt(inv(D)), D diagonal
    A_hat = D_hat @ A @ D_hat
    return jnp.asarray(A_hat, dtype=jnp.float32)


# ---------------------------------------------------------------------------
# helpers
# ---------------------------------------------------------------------------
_MIB = 1024 * 1024
_TILE_CANDS = (1024, 512, 256, 128)


def _round_up(x: int, m: int) -> int:
    return ((x + m - 1) // m) * m


def _vmem_limit_bytes() -> int:
    """Explicit scoped-VMEM request (defaults are 16/32 MiB, far below physical)."""
    try:
        cap = int(getattr(pltpu.get_tpu_info(), "vmem_capacity_bytes", 64 * _MIB))
    except Exception:  # hardware query unavailable -> conservative default
        cap = 64 * _MIB
    # leave room for compiler-internal scratch; stays under v7x's 64 MiB/TC
    return int(min(max(cap * 5 // 8, 32 * _MIB), 80 * _MIB))


def _choose_tiles(N, BC, P, in_isz, out_isz, vmem_budget, row_align):
    """Pick (N_pad, tm, tk) so all double-buffered blocks fit the VMEM budget."""

    def footprint(tm, tk):
        return (2 * tm * tk * in_isz        # adj tile (double buffered)
                + 2 * tk * BC * in_isz      # xs tile
                + 2 * BC * P * in_isz       # wb (grid-invariant, still 2 bufs)
                + 2 * tm * P * out_isz      # output tile
                + tm * BC * 4)              # f32 accumulator scratch

    # 1) Small graphs: a single grid step.  Per-step overhead (~0.35 us)
    #    dominates toy problems and v5e/v6e have one TensorCore anyway.
    n1 = _round_up(N, row_align)
    if n1 <= 512 and footprint(n1, n1) <= vmem_budget:
        return n1, n1, n1

    # 2) Medium graphs: row tiles only (full-depth K), tm sized to the budget,
    #    preferring >= 2 row tiles so both v7x TensorCores get work and tiles
    #    of >= 512 rows (measured ~85% of HBM roofline).
    med = []
    for tm in _TILE_CANDS:
        n_pad = _round_up(N, tm)
        if footprint(tm, n_pad) <= vmem_budget:
            key = (0 if n_pad // tm >= 2 else 1, -min(tm, 512), n_pad, -tm)
            med.append((key, tm, n_pad))
    if med:
        _, tm, n_pad = min(med)
        return n_pad, tm, n_pad

    # 3) Large graphs: row tiles x K tiles, both bounded -> VMEM use constant
    #    in N (needed on v7x's 64 MiB per-TensorCore VMEM).
    best = None
    for tk in _TILE_CANDS:
        for tm in _TILE_CANDS:
            if footprint(tm, tk) > vmem_budget:
                continue
            score = (min(tm, 512) * min(tk, 1024), tm * tk)
            if best is None or score > best[0]:
                best = (score, tm, tk)
    if best is None:                        # pathological BC/P; minimal tiles
        tm = tk = max(128, row_align)
    else:
        _, tm, tk = best
    return _round_up(N, max(tm, tk)), tm, tk


# ---------------------------------------------------------------------------
# Pallas kernel: one adj row-tile x one K-tile, all batches at once
# ---------------------------------------------------------------------------
def _gcn_kernel(adj_ref, xs_ref, wb_ref, o_ref, acc_ref):
    # adj_ref: (tm, tk)  tile of the normalized adjacency
    # xs_ref : (tk, BC)  K-tile of the batch-concatenated node features
    # wb_ref : (BC, P)   block-diagonal W.T, zero-padded so P % 128 == 0
    # o_ref  : (tm, P)   lane-dense output slab tile
    # acc_ref: (tm, BC)  f32 accumulator, persistent across the K axis
    k = pl.program_id(1)

    @pl.when(k == 0)
    def _():
        acc_ref[...] = jnp.zeros_like(acc_ref)

    acc_ref[...] += jnp.dot(adj_ref[...], xs_ref[...],
                            preferred_element_type=jnp.float32)

    @pl.when(k == pl.num_programs(1) - 1)
    def _():
        out = jnp.dot(acc_ref[...].astype(wb_ref.dtype), wb_ref[...],
                      preferred_element_type=jnp.float32)
        o_ref[...] = out.astype(o_ref.dtype)


# ---------------------------------------------------------------------------
# wrapper: one-time prep (cache across calls) + jitted apply
# ---------------------------------------------------------------------------
def make_graph_convolution(w: jnp.ndarray, adj: jnp.ndarray, *, batch_size: int,
                           compute_dtype=jnp.bfloat16, out_dtype=jnp.float32):
    """Build a cached GCN layer.  Returns apply(x) -> (B, N, C_out) with
    output[b] = adj @ (x[b] @ w.T).  adj cast/pad and the block-diagonal
    projection weight are built once here, not per call."""
    C_out, C_in = w.shape
    N = adj.shape[0]
    B = batch_size
    BC = B * C_in
    cdt = np.dtype(compute_dtype)
    odt = np.dtype(out_dtype)
    in_isz, out_isz = cdt.itemsize, odt.itemsize

    # lane-dense output width (unmasked full-lane stores)
    P = _round_up(max(B * C_out, 128), 128)

    # sublane alignment for the compute dtype (f32: 8, bf16: 16, int8: 32)
    row_align = max(8, 32 // in_isz)

    vmem_limit = _vmem_limit_bytes()
    N_pad, tm, tk = _choose_tiles(N, BC, P, in_isz, out_isz,
                                  vmem_budget=vmem_limit - 4 * _MIB,
                                  row_align=row_align)

    # --- one-time operand prep (hoisted out of the per-call path) -----------
    adj_p = jnp.pad(jnp.asarray(adj).astype(cdt),
                    ((0, N_pad - N), (0, N_pad - N)))
    wt = jnp.asarray(w).T.astype(cdt)                        # (C_in, C_out)
    wb = jnp.kron(jnp.eye(B, dtype=cdt), wt)                 # block-diagonal W.T
    wb = jnp.pad(wb, ((0, 0), (0, P - B * C_out)))
    # NOTE: once B*C_in grows past ~256, the block-diagonal projection should
    # be replaced by a per-batch lane-slice loop inside the kernel (the
    # block-diagonal form wastes MXU flops proportional to B).

    grid = (N_pad // tm, N_pad // tk)

    cost = pl.CostEstimate(
        flops=2 * N_pad * N_pad * BC + 2 * N_pad * BC * P,
        transcendentals=0,
        bytes_accessed=(N_pad * N_pad + N_pad * BC + BC * P) * in_isz
                       + N_pad * P * out_isz,
    )

    kernel = pl.pallas_call(
        _gcn_kernel,
        out_shape=jax.ShapeDtypeStruct((N_pad, P), odt),
        grid_spec=pltpu.PrefetchScalarGridSpec(
            num_scalar_prefetch=0,
            grid=grid,
            in_specs=[
                pl.BlockSpec((tm, tk), lambda i, k: (i, k)),    # adj tile
                pl.BlockSpec((tk, BC), lambda i, k: (k, 0)),    # xs K-tile
                pl.BlockSpec((BC, P), lambda i, k: (0, 0)),     # wb, grid-invariant
            ],
            out_specs=pl.BlockSpec((tm, P), lambda i, k: (i, 0)),
            scratch_shapes=[pltpu.VMEM((tm, BC), jnp.float32)],
        ),
        compiler_params=pltpu.CompilerParams(
            # row tiles are independent (v7x megacore); K axis is a reduction
            dimension_semantics=("parallel", "arbitrary"),
            vmem_limit_bytes=vmem_limit,
        ),
        cost_estimate=cost,
    )

    def _apply(adj_pad, wblk, x):
        # fold batch into lanes: xs[:, b*C_in:(b+1)*C_in] == x[b]
        xs = jnp.transpose(x, (1, 0, 2)).reshape(N, BC).astype(cdt)
        if N_pad != N:
            xs = jnp.pad(xs, ((0, N_pad - N), (0, 0)))
        out_slab = kernel(adj_pad, xs, wblk)
        # strip row/lane padding, unfold batch (fused under jit with the call)
        out = out_slab[:N, :B * C_out].reshape(N, B, C_out)
        return jnp.transpose(out, (1, 0, 2)).astype(odt)

    return functools.partial(jax.jit(_apply), adj_p, wb)


def graph_convolution(x: jnp.ndarray, w: jnp.ndarray, adj: jnp.ndarray,
                      *, compute_dtype=jnp.bfloat16) -> jnp.ndarray:
    """Single-shot convenience wrapper: output[b] = adj @ (x[b] @ w.T)."""
    fn = make_graph_convolution(w, adj, batch_size=x.shape[0],
                                compute_dtype=compute_dtype, out_dtype=x.dtype)
    return fn(x)


if __name__ == "__main__":
    # small shapes: batch=2, img_size=8 -> N=64 nodes, in_features=16, out_features=32
    B, img_size, C_in, C_out = 2, 8, 16, 32
    N = img_size * img_size

    adj = create_adj_matrix(img_size)

    key = jax.random.PRNGKey(0)
    kx, kw = jax.random.split(key)
    x = jax.random.normal(kx, (B, N, C_in), dtype=jnp.float32)

    # nn.Linear(in, out, bias=False) weight, stored as (out, in)
    bound = 1.0 / np.sqrt(C_in)
    w = jax.random.uniform(kw, (C_out, C_in), dtype=jnp.float32,
                           minval=-bound, maxval=bound)

    # reference (plain JAX): output[b] = adj @ (x[b] @ w.T)
    ref = jnp.einsum("nm,bmf->bnf", adj, jnp.einsum("bni,oi->bno", x, w))

    # default path: bf16 operands, f32 MXU accumulation
    gcn_bf16 = make_graph_convolution(w, adj, batch_size=B)
    out_bf16 = jax.block_until_ready(gcn_bf16(x))
    assert out_bf16.shape == (B, N, C_out)
    np.testing.assert_allclose(np.asarray(out_bf16), np.asarray(ref),
                               rtol=5e-2, atol=5e-2)

    # full-f32 compute path
    gcn_f32 = make_graph_convolution(w, adj, batch_size=B,
                                     compute_dtype=jnp.float32)
    out_f32 = jax.block_until_ready(gcn_f32(x))
    np.testing.assert_allclose(np.asarray(out_f32), np.asarray(ref),
                               rtol=2e-4, atol=2e-4)

    print("KERNEL_OK")
</pallas_src>

<mosaic_0001>
module attributes {stable_mosaic.version = 11 : i64} {
  func.func @_gcn_kernel(%arg0: i32, %arg1: i32, %arg2: memref<64x64xbf16, #tpu.memory_space<vmem>>, %arg3: memref<64x32xbf16, #tpu.memory_space<vmem>>, %arg4: memref<32x128xbf16, #tpu.memory_space<vmem>>, %arg5: memref<64x128xf32, #tpu.memory_space<vmem>>, %arg6: memref<64x32xf32, #tpu.memory_space<vmem>>) attributes {dimension_semantics = [#tpu.dimension_semantics<parallel>, #tpu.dimension_semantics<arbitrary>], iteration_bounds = array<i64: 1, 1>, scalar_prefetch = 0 : i64, scratch_operands = 1 : i64, tpu.core_type = #tpu.core_type<tc>, window_params = [{transform_indices = @transform_0, window_bounds = array<i64: 64, 64>}, {transform_indices = @transform_1, window_bounds = array<i64: 64, 32>}, {pipeline_mode = #tpu.pipeline_mode<synchronous>, transform_indices = @transform_2, window_bounds = array<i64: 32, 128>}, {transform_indices = @transform_3, window_bounds = array<i64: 64, 128>}]} {
    %c0_i32 = arith.constant 0 : i32
    %0 = arith.cmpi eq, %arg1, %c0_i32 : i32
    %1 = arith.extui %0 : i1 to i32
    %c0_i32_0 = arith.constant 0 : i32
    %2 = arith.cmpi ne, %1, %c0_i32_0 : i32
    scf.if %2 {
      %cst_10 = arith.constant 0.000000e+00 : f32
      %12 = vector.broadcast %cst_10 : f32 to vector<64x32xf32>
      %c0_11 = arith.constant 0 : index
      %c0_12 = arith.constant 0 : index
      %13 = vector.load %arg6[%c0_11, %c0_12] : memref<64x32xf32, #tpu.memory_space<vmem>>, vector<64x32xf32>
      tpu.vector_store %arg6[%c0_11, %c0_12], %12 {strides = array<i32>} : memref<64x32xf32, #tpu.memory_space<vmem>>, vector<64x32xf32>,
    } else {
    }
    %c0 = arith.constant 0 : index
    %c0_1 = arith.constant 0 : index
    %3 = vector.load %arg6[%c0, %c0_1] : memref<64x32xf32, #tpu.memory_space<vmem>>, vector<64x32xf32>
    %c0_2 = arith.constant 0 : index
    %c0_3 = arith.constant 0 : index
    %4 = vector.load %arg2[%c0_2, %c0_3] : memref<64x64xbf16, #tpu.memory_space<vmem>>, vector<64x64xbf16>
    %c0_4 = arith.constant 0 : index
    %c0_5 = arith.constant 0 : index
    %5 = vector.load %arg3[%c0_4, %c0_5] : memref<64x32xbf16, #tpu.memory_space<vmem>>, vector<64x32xbf16>
    %cst = arith.constant dense<0.000000e+00> : vector<64x32xf32>
    %6 = tpu.matmul %4, %5, %cst {dimension_numbers = #tpu.dot_dimension_numbers<[1], [0], [0], [1], [0, 0, 1, 1], [], []>} : vector<64x64xbf16>, vector<64x32xbf16>, vector<64x32xf32> -> vector<64x32xf32>
    %7 = arith.addf %3, %6 : vector<64x32xf32>
    %c0_6 = arith.constant 0 : index
    %c0_7 = arith.constant 0 : index
    %8 = vector.load %arg6[%c0_6, %c0_7] : memref<64x32xf32, #tpu.memory_space<vmem>>, vector<64x32xf32>
    tpu.vector_store %arg6[%c0_6, %c0_7], %7 {strides = array<i32>} : memref<64x32xf32, #tpu.memory_space<vmem>>, vector<64x32xf32>,
    %c0_i32_8 = arith.constant 0 : i32
    %9 = arith.cmpi eq, %arg1, %c0_i32_8 : i32
    %10 = arith.extui %9 : i1 to i32
    %c0_i32_9 = arith.constant 0 : i32
    %11 = arith.cmpi ne, %10, %c0_i32_9 : i32
    scf.if %11 {
      %c0_10 = arith.constant 0 : index
      %c0_11 = arith.constant 0 : index
      %12 = vector.load %arg6[%c0_10, %c0_11] : memref<64x32xf32, #tpu.memory_space<vmem>>, vector<64x32xf32>
      %13 = arith.truncf %12 : vector<64x32xf32> to vector<64x32xbf16>
      %c0_12 = arith.constant 0 : index
      %c0_13 = arith.constant 0 : index
      %14 = vector.load %arg4[%c0_12, %c0_13] : memref<32x128xbf16, #tpu.memory_space<vmem>>, vector<32x128xbf16>
      %cst_14 = arith.constant dense<0.000000e+00> : vector<64x128xf32>
      %15 = tpu.matmul %13, %14, %cst_14 {dimension_numbers = #tpu.dot_dimension_numbers<[1], [0], [0], [1], [0, 0, 1, 1], [], []>} : vector<64x32xbf16>, vector<32x128xbf16>, vector<64x128xf32> -> vector<64x128xf32>
      %c0_15 = arith.constant 0 : index
      %c0_16 = arith.constant 0 : index
      %16 = vector.load %arg5[%c0_15, %c0_16] : memref<64x128xf32, #tpu.memory_space<vmem>>, vector<64x128xf32>
      tpu.vector_store %arg5[%c0_15, %c0_16], %15 {strides = array<i32>} : memref<64x128xf32, #tpu.memory_space<vmem>>, vector<64x128xf32>,
    } else {
    }
    return
  }
  func.func @transform_0(%arg0: i32, %arg1: i32) -> (i32, i32) {
    %c0_i32 = arith.constant 0 : i32
    return %arg0, %arg1 : i32, i32
  }
  func.func @transform_1(%arg0: i32, %arg1: i32) -> (i32, i32) {
    %c0_i32 = arith.constant 0 : i32
    %c0_i32_0 = arith.constant 0 : i32
    return %arg1, %c0_i32 : i32, i32
  }
  func.func @transform_2(%arg0: i32, %arg1: i32) -> (i32, i32) {
    %c0_i32 = arith.constant 0 : i32
    %c0_i32_0 = arith.constant 0 : i32
    %c0_i32_1 = arith.constant 0 : i32
    return %c0_i32, %c0_i32_0 : i32, i32
  }
  func.func @transform_3(%arg0: i32, %arg1: i32) -> (i32, i32) {
    %c0_i32 = arith.constant 0 : i32
    %c0_i32_0 = arith.constant 0 : i32
    return %arg0, %c0_i32 : i32, i32
  }
}

</mosaic_0001>

<bundles_post_ra>
// kernel: _apply.1
= control target key start
LH: loop header
LB: loop body
LE: loop exit
PB: predicated region body
PF: predicated region fallthrough
CT: control target
= control target key end

     0   :  { %vm19_vm0 = vcmask 261120   ;;  %v304_v2 = vmov 0.0   ;;  %vm96_vm1 = vcmask 523264   ;;  %s399_s1 = inlined_call_operand.vmem [shape: bf16[64,32], index: 1, kind: input, shape index: {}]   ;;  %s400_s0 = inlined_call_operand.vmem [shape: bf16[64,64], index: 0, kind: input, shape index: {}]   ;;  %s401_s2 = inlined_call_operand.vmem [shape: bf16[32,128], index: 2, kind: input, shape index: {}]   ;;  %s402_s3 = inlined_call_operand.vmem [shape: f32[64,128], index: 3, kind: output, shape index: {}]  }
   0x1   :  { %v294_v0 = vld [vmem:[%s399_s1 + $0x18] sm:$0xff]  ;;  %v293_v1 = vld [vmem:[%s399_s1 + $0x10] sm:$0xff]  ;;  %20 = vst.msk [vmem:[#allocation2] sm:$0xff] %vm19_vm0, %v304_v2  ;;  %v292_v3 = vld [vmem:[%s399_s1 + $0x8] sm:$0xff] }
   0x2   :  { %113 = vmatpush.bf16.msra.mxu0 %v294_v0  ;;  %297 = vmatpush.bf16.msra.mxu2 %v294_v0  ;;  %21 = vst.msk [vmem:[#allocation2 + $0x8] sm:$0xff] %vm19_vm0, %v304_v2  ;;  %v291_v4 = vld [vmem:[%s399_s1] sm:$0xff]  ;;  %v289_v6 = vld [vmem:[%s400_s0 + $0x10] sm:$0xff]  ;;  %v288_v7 = vld [vmem:[%s400_s0 + $0x8] sm:$0xff] }
   0x3   :  { %22 = vst.msk [vmem:[#allocation2 + $0x10] sm:$0xff] %vm19_vm0, %v304_v2  ;;  %v287_v5 = vld [vmem:[%s400_s0] sm:$0xff]  ;;  %v290_v8 = vld [vmem:[%s400_s0 + $0x18] sm:$0xff]  ;;  %v296_v9 = vld [vmem:[%s401_s2 + $0x8] sm:$0xff] }
   0x4   :  { %23 = vst.msk [vmem:[#allocation2 + $0x18] sm:$0xff] %vm19_vm0, %v304_v2  ;;  %204 = vmatpush.bf16.msra.mxu1 %v296_v9  ;;  %301 = vmatpush.bf16.msra.mxu3 %v296_v9  ;;  %v295_v10 = vld [vmem:[%s401_s2] sm:$0xff] }
   0x5   :  { %24 = vst.msk [vmem:[#allocation2 + $0x20] sm:$0xff] %vm19_vm0, %v304_v2 }
   0x6   :  { %114 = vmatpush.bf16.msra.mxu0 %v293_v1  ;;  %298 = vmatpush.bf16.msra.mxu2 %v293_v1  ;;  %25 = vst.msk [vmem:[#allocation2 + $0x28] sm:$0xff] %vm19_vm0, %v304_v2 }
   0x7   :  { %26 = vst.msk [vmem:[#allocation2 + $0x30] sm:$0xff] %vm19_vm0, %v304_v2 }
   0x8   :  { %27 = vst.msk [vmem:[#allocation2 + $0x38] sm:$0xff] %vm19_vm0, %v304_v2  ;;  %205 = vmatpush.bf16.msra.mxu1 %v295_v10  ;;  %302 = vmatpush.bf16.msra.mxu3 %v295_v10  ;;  %v28_v11 = vld [vmem:[#allocation2] sm:$0xff] }
   0x9   :  { %v29_v15 = vld [vmem:[#allocation2 + $0x8] sm:$0xff] }
   0xa   :  { %115 = vmatpush.bf16.msra.mxu0 %v292_v3  ;;  %299 = vmatpush.bf16.msra.mxu2 %v292_v3  ;;  %v30_v21 = vld [vmem:[#allocation2 + $0x10] sm:$0xff] }
   0xb   :  { %v31_v30 = vld [vmem:[#allocation2 + $0x18] sm:$0xff] }
   0xc   :  { %v32_v14 = vld [vmem:[#allocation2 + $0x20] sm:$0xff] }
   0xd   :  { %v33_v20 = vld [vmem:[#allocation2 + $0x28] sm:$0xff] }
   0xe   :  { %116 = vmatpush.bf16.msra.mxu0 %v291_v4  ;;  %300 = vmatpush.bf16.msra.mxu2 %v291_v4  ;;  %v34_v29 = vld [vmem:[#allocation2 + $0x30] sm:$0xff] }
   0xf   :  { %v35_v35 = vld [vmem:[#allocation2 + $0x38] sm:$0xff] }
  0x11   :  { %271 = vmatmul.msk.bf16.vlgmr.msra.gmra.mxu0 %vm96_vm1, %v287_v5  ;;  %273 = vmatmul.msk.bf16.vlgmr.msra.gmra.mxu2 %vm96_vm1, %v289_v6 }
  0x21   :  { %272 = vmatmul.msk.bf16.gmra.mxu0 %vm96_vm1, %v288_v7  ;;  %274 = vmatmul.msk.bf16.gmra.mxu2 %vm96_vm1, %v290_v8 }
  0x8e   :  { %v118_v12 = vpop.f32.mrf.mxu0 }
  0x8f   :  { %v138_v13 = vadd.f32 %v118_v12, %v28_v11 }
  0x91   :  { %147 = vst.msk [vmem:[#allocation2] sm:$0xff] %vm19_vm0, %v138_v13 }
  0x94   :  { %v128_v16 = vpop.f32.mrf.mxu2 }
  0x95   :  { %v142_v17 = vadd.f32 %v128_v16, %v32_v14 }
  0x96   :  { %v120_v18 = vpop.f32.mrf.mxu0 }
  0x97   :  { %v139_v19 = vadd.f32 %v120_v18, %v29_v15  ;;  %151 = vst.msk [vmem:[#allocation2 + $0x20] sm:$0xff] %vm19_vm0, %v142_v17 }
  0x98   :  { %v158_v26 = vld [vmem:[#allocation2] sm:$0xff] }
  0x99   :  { %148 = vst.msk [vmem:[#allocation2 + $0x8] sm:$0xff] %vm19_vm0, %v139_v19 }
  0x9c   :  { %v130_v22 = vpop.f32.mrf.mxu2 }
  0x9d   :  { %v143_v23 = vadd.f32 %v130_v22, %v33_v20 }
  0x9e   :  { %v123_v24 = vpop.f32.mrf.mxu0  ;;  %v162_v41 = vld [vmem:[#allocation2 + $0x20] sm:$0xff] }
  0x9f   :  { %v140_v25 = vadd.f32 %v123_v24, %v30_v21  ;;  %152 = vst.msk [vmem:[#allocation2 + $0x28] sm:$0xff] %vm19_vm0, %v143_v23 }
  0xa0   :  { %v159_v27 = vld [vmem:[#allocation2 + $0x8] sm:$0xff] }
  0xa1   :  { %149 = vst.msk [vmem:[#allocation2 + $0x10] sm:$0xff] %vm19_vm0, %v140_v25  ;;  %v166_v28 = vpack.c.bf16 %v159_v27, %v158_v26 }
  0xa3   :  { %283 = vmatmul.msk.bf16.vlgmr.msra.gmra.mxu1 %vm19_vm0, %v166_v28 }
  0xa4   :  { %v133_v31 = vpop.f32.mrf.mxu2 }
  0xa5   :  { %v144_v32 = vadd.f32 %v133_v31, %v34_v29 }
  0xa6   :  { %v125_v33 = vpop.f32.mrf.mxu0  ;;  %v163_v42 = vld [vmem:[#allocation2 + $0x28] sm:$0xff] }
  0xa7   :  { %v141_v34 = vadd.f32 %v125_v33, %v31_v30  ;;  %153 = vst.msk [vmem:[#allocation2 + $0x30] sm:$0xff] %vm19_vm0, %v144_v32  ;;  %v168_v43 = vpack.c.bf16 %v163_v42, %v162_v41 }
  0xa8   :  { %v160_v38 = vld [vmem:[#allocation2 + $0x10] sm:$0xff] }
  0xa9   :  { %150 = vst.msk [vmem:[#allocation2 + $0x18] sm:$0xff] %vm19_vm0, %v141_v34 }
  0xac   :  { %v135_v36 = vpop.f32.mrf.mxu2 }
  0xad   :  { %v145_v37 = vadd.f32 %v135_v36, %v35_v35 }
  0xae   :  { %v164_v44 = vld [vmem:[#allocation2 + $0x30] sm:$0xff] }
  0xaf   :  { %154 = vst.msk [vmem:[#allocation2 + $0x38] sm:$0xff] %vm19_vm0, %v145_v37 }
  0xb0   :  { %v161_v39 = vld [vmem:[#allocation2 + $0x18] sm:$0xff] }
  0xb1   :  { %v167_v40 = vpack.c.bf16 %v161_v39, %v160_v38 }
  0xb3   :  { %284 = vmatmul.msk.bf16.vlgmr.msra.gmra.mxu3 %vm19_vm0, %v167_v40 }
  0xb6   :  { %v165_v45 = vld [vmem:[#allocation2 + $0x38] sm:$0xff] }
  0xb7   :  { %v169_v46 = vpack.c.bf16 %v165_v45, %v164_v44 }
  0xc3   :  { %285 = vmatmul.msk.bf16.gmra.mxu3 %vm19_vm0, %v168_v43 }
  0xd3   :  { %286 = vmatmul.msk.bf16.gmra.mxu3 %vm19_vm0, %v169_v46 }
 0x120   :  { %v207_v47 = vpop.f32.mrf.mxu1 }
 0x121   :  { %227 = vst [vmem:[%s402_s3] sm:$0xff] %v207_v47 }
 0x128   :  { %v209_v48 = vpop.f32.mrf.mxu1 }
 0x129   :  { %228 = vst [vmem:[%s402_s3 + $0x8] sm:$0xff] %v209_v48 }
 0x136   :  { %v212_v49 = vpop.f32.mrf.mxu3 }
 0x137   :  { %229 = vst [vmem:[%s402_s3 + $0x10] sm:$0xff] %v212_v49 }
 0x13e   :  { %v214_v50 = vpop.f32.mrf.mxu3 }
 0x13f   :  { %230 = vst [vmem:[%s402_s3 + $0x18] sm:$0xff] %v214_v50 }
 0x146   :  { %v217_v51 = vpop.f32.mrf.mxu3 }
 0x147   :  { %231 = vst [vmem:[%s402_s3 + $0x20] sm:$0xff] %v217_v51 }
 0x14e   :  { %v219_v52 = vpop.f32.mrf.mxu3 }
 0x14f   :  { %232 = vst [vmem:[%s402_s3 + $0x28] sm:$0xff] %v219_v52 }
 0x156   :  { %v222_v53 = vpop.f32.mrf.mxu3 }
 0x157   :  { %233 = vst [vmem:[%s402_s3 + $0x30] sm:$0xff] %v222_v53 }
 0x15e   :  { %v224_v54 = vpop.f32.mrf.mxu3 }
 0x15f   :  { %234 = vst [vmem:[%s402_s3 + $0x38] sm:$0xff] %v224_v54 }

</bundles_post_ra>
